<compile_context>
chip_gen: v6e
topology: v6e:2x2x1
jax: 0.10.0
libtpu: 0.0.40
codegen_flags: <defaults>
</compile_context>

<pallas_src>
import jax
import jax.numpy as jnp
import numpy as np
from jax.experimental import pallas as pl
from jax.experimental.pallas import tpu as pltpu

# Problem sizes (Conv2d(4, 8, 3, padding=1) block).
N, CIN, H, W = 2, 4, 16, 16
COUT, KH, KW = 8, 3, 3
PAD = 1
EPS = 1e-5  # BatchNorm2d default eps

NHW = N * H * W        # 512 -> lane axis, multiple of 128 (lane-dense stores)
KKC = KH * KW * CIN    # 36  -> single matmul contraction axis


def fused_conv_bn_kernel(w_ref, pat_ref, gamma_ref, beta_ref, o_ref):
    """Fused conv (one im2col matmul) + training-mode BatchNorm, channel-major.

    w_ref:     (COUT, KKC)   flattened conv weight
    pat_ref:   (KKC, NHW)    im2col patch matrix (channel-major)
    gamma_ref: (COUT, 1)     BN weight
    beta_ref:  (COUT, 1)     BN bias
    o_ref:     (COUT, NHW)   normalized output (lane-dense last dim)
    """
    # Conv as one MXU matmul: (COUT, KKC) @ (KKC, NHW) -> (COUT, NHW), f32 acc.
    y = jnp.dot(w_ref[...], pat_ref[...], preferred_element_type=jnp.float32)

    # Per-channel (per-row) batch statistics; two-pass (centered) variance.
    inv_count = 1.0 / float(NHW)
    mean = jnp.sum(y, axis=1, keepdims=True) * inv_count        # (COUT, 1)
    c = y - mean
    var = jnp.sum(c * c, axis=1, keepdims=True) * inv_count     # (COUT, 1)
    scale = gamma_ref[...] * jax.lax.rsqrt(var + EPS)           # (COUT, 1), EUP

    o_ref[...] = c * scale + beta_ref[...]


def base_block(x_nchw, w_oihw, conv_bias, gamma, beta):
    """Forward pass of BaseBlock.  x_nchw: (N, CIN, H, W) float32 -> NCHW out.

    The conv bias is intentionally dropped: a per-channel constant added before
    training-mode BatchNorm is cancelled exactly by the mean subtraction and
    leaves the variance unchanged.
    """
    del conv_bias  # mathematically cancelled by BN's batch-mean subtraction

    # Layout plumbing (wrapper-side XLA): NCHW -> NHWC, OIHW -> HWIO.
    x = jnp.transpose(x_nchw, (0, 2, 3, 1)).astype(jnp.float32)       # (N,H,W,CIN)
    w_hwio = jnp.transpose(w_oihw, (2, 3, 1, 0)).astype(jnp.float32)  # (KH,KW,CIN,COUT)

    # im2col patch matrix, channel-major: (KKC, N*H*W).
    xp = jnp.pad(x, ((0, 0), (PAD, PAD), (PAD, PAD), (0, 0)))
    cols = [xp[:, kh:kh + H, kw:kw + W, :]
            for kh in range(KH) for kw in range(KW)]                  # each (N,H,W,CIN)
    patches = jnp.concatenate(cols, axis=-1).reshape(NHW, KKC).T      # (KKC, NHW)

    w_cm = w_hwio.reshape(KKC, COUT).T                                # (COUT, KKC)

    out_cm = pl.pallas_call(
        fused_conv_bn_kernel,
        out_shape=jax.ShapeDtypeStruct((COUT, NHW), jnp.float32),
        grid_spec=pltpu.PrefetchScalarGridSpec(
            num_scalar_prefetch=0,
            grid=(1,),  # single step: whole working set (~80 KB) fits VMEM easily
            in_specs=[
                pl.BlockSpec((COUT, KKC), lambda i: (0, 0)),
                pl.BlockSpec((KKC, NHW), lambda i: (0, 0)),
                pl.BlockSpec((COUT, 1), lambda i: (0, 0)),
                pl.BlockSpec((COUT, 1), lambda i: (0, 0)),
            ],
            out_specs=pl.BlockSpec((COUT, NHW), lambda i: (0, 0)),
        ),
        compiler_params=pltpu.CompilerParams(
            dimension_semantics=("arbitrary",)),
    )(w_cm, patches,
      gamma.reshape(COUT, 1).astype(jnp.float32),
      beta.reshape(COUT, 1).astype(jnp.float32))

    # (COUT, N*H*W) -> (N, COUT, H, W) to match the PyTorch output convention.
    return jnp.transpose(out_cm.reshape(COUT, N, H, W), (1, 0, 2, 3))


def reference(x_nchw, w_oihw, conv_bias, gamma, beta):
    """Pure-JAX reference: Conv2d (with bias) + training-mode BatchNorm2d."""
    x = jnp.transpose(x_nchw, (0, 2, 3, 1))
    w = jnp.transpose(w_oihw, (2, 3, 1, 0))
    y = jax.lax.conv_general_dilated(
        x, w, window_strides=(1, 1), padding=((PAD, PAD), (PAD, PAD)),
        dimension_numbers=("NHWC", "HWIO", "NHWC")) + conv_bias
    mean = y.mean(axis=(0, 1, 2))
    var = y.var(axis=(0, 1, 2))  # biased batch variance (BN normalization)
    yn = (y - mean) / jnp.sqrt(var + EPS) * gamma + beta
    return jnp.transpose(yn, (0, 3, 1, 2))


if __name__ == "__main__":
    key = jax.random.PRNGKey(0)
    kx, kw, kb, kg, kbe = jax.random.split(key, 5)

    x = jax.random.normal(kx, (N, CIN, H, W), jnp.float32)           # NCHW input
    w_oihw = 0.1 * jax.random.normal(kw, (COUT, CIN, KH, KW), jnp.float32)
    conv_bias = 0.1 * jax.random.normal(kb, (COUT,), jnp.float32)
    gamma = 1.0 + 0.1 * jax.random.normal(kg, (COUT,), jnp.float32)  # BN weight
    beta = 0.1 * jax.random.normal(kbe, (COUT,), jnp.float32)        # BN bias

    out = jax.block_until_ready(base_block(x, w_oihw, conv_bias, gamma, beta))
    ref = jax.block_until_ready(reference(x, w_oihw, conv_bias, gamma, beta))

    np.testing.assert_allclose(np.asarray(out), np.asarray(ref),
                               rtol=2e-3, atol=2e-3)
    print("KERNEL_OK")
</pallas_src>

<mosaic_0001>
module attributes {stable_mosaic.version = 11 : i64} {
  func.func @fused_conv_bn_kernel(%arg0: i32, %arg1: memref<8x36xf32, #tpu.memory_space<vmem>>, %arg2: memref<36x512xf32, #tpu.memory_space<vmem>>, %arg3: memref<8x1xf32, #tpu.memory_space<vmem>>, %arg4: memref<8x1xf32, #tpu.memory_space<vmem>>, %arg5: memref<8x512xf32, #tpu.memory_space<vmem>>) attributes {dimension_semantics = [#tpu.dimension_semantics<arbitrary>], iteration_bounds = array<i64: 1>, scalar_prefetch = 0 : i64, scratch_operands = 0 : i64, tpu.core_type = #tpu.core_type<tc>, window_params = [{pipeline_mode = #tpu.pipeline_mode<synchronous>, transform_indices = @transform_0, window_bounds = array<i64: 8, 36>}, {pipeline_mode = #tpu.pipeline_mode<synchronous>, transform_indices = @transform_1, window_bounds = array<i64: 36, 512>}, {pipeline_mode = #tpu.pipeline_mode<synchronous>, transform_indices = @transform_2, window_bounds = array<i64: 8, 1>}, {pipeline_mode = #tpu.pipeline_mode<synchronous>, transform_indices = @transform_3, window_bounds = array<i64: 8, 1>}, {pipeline_mode = #tpu.pipeline_mode<synchronous>, transform_indices = @transform_4, window_bounds = array<i64: 8, 512>}]} {
    %c0 = arith.constant 0 : index
    %c0_0 = arith.constant 0 : index
    %0 = vector.load %arg1[%c0, %c0_0] : memref<8x36xf32, #tpu.memory_space<vmem>>, vector<8x36xf32>
    %c0_1 = arith.constant 0 : index
    %c0_2 = arith.constant 0 : index
    %1 = vector.load %arg2[%c0_1, %c0_2] : memref<36x512xf32, #tpu.memory_space<vmem>>, vector<36x512xf32>
    %cst = arith.constant dense<0.000000e+00> : vector<8x512xf32>
    %2 = tpu.matmul %0, %1, %cst {dimension_numbers = #tpu.dot_dimension_numbers<[1], [0], [0], [1], [0, 0, 1, 1], [], []>} : vector<8x36xf32>, vector<36x512xf32>, vector<8x512xf32> -> vector<8x512xf32>
    %cst_3 = arith.constant dense<0.000000e+00> : vector<8xf32>
    %3 = vector.multi_reduction <add>, %2, %cst_3 [1] : vector<8x512xf32> to vector<8xf32>
    %4 = vector.shape_cast %3 : vector<8xf32> to vector<8x1xf32>
    %cst_4 = arith.constant 0.001953125 : f32
    %5 = vector.broadcast %cst_4 : f32 to vector<8x1xf32>
    %6 = arith.mulf %4, %5 : vector<8x1xf32>
    %7 = vector.broadcast %6 : vector<8x1xf32> to vector<8x512xf32>
    %8 = arith.subf %2, %7 : vector<8x512xf32>
    %9 = arith.mulf %8, %8 : vector<8x512xf32>
    %cst_5 = arith.constant dense<0.000000e+00> : vector<8xf32>
    %10 = vector.multi_reduction <add>, %9, %cst_5 [1] : vector<8x512xf32> to vector<8xf32>
    %11 = vector.shape_cast %10 : vector<8xf32> to vector<8x1xf32>
    %cst_6 = arith.constant 0.001953125 : f32
    %12 = vector.broadcast %cst_6 : f32 to vector<8x1xf32>
    %13 = arith.mulf %11, %12 : vector<8x1xf32>
    %c0_7 = arith.constant 0 : index
    %c0_8 = arith.constant 0 : index
    %14 = vector.load %arg3[%c0_7, %c0_8] : memref<8x1xf32, #tpu.memory_space<vmem>>, vector<8x1xf32>
    %cst_9 = arith.constant 9.99999974E-6 : f32
    %15 = vector.broadcast %cst_9 : f32 to vector<8x1xf32>
    %16 = arith.addf %13, %15 : vector<8x1xf32>
    %17 = math.rsqrt %16 : vector<8x1xf32>
    %18 = arith.mulf %14, %17 : vector<8x1xf32>
    %19 = vector.broadcast %18 : vector<8x1xf32> to vector<8x512xf32>
    %20 = arith.mulf %8, %19 : vector<8x512xf32>
    %c0_10 = arith.constant 0 : index
    %c0_11 = arith.constant 0 : index
    %21 = vector.load %arg4[%c0_10, %c0_11] : memref<8x1xf32, #tpu.memory_space<vmem>>, vector<8x1xf32>
    %22 = vector.broadcast %21 : vector<8x1xf32> to vector<8x512xf32>
    %23 = arith.addf %20, %22 : vector<8x512xf32>
    %c0_12 = arith.constant 0 : index
    %c0_13 = arith.constant 0 : index
    %24 = vector.load %arg5[%c0_12, %c0_13] : memref<8x512xf32, #tpu.memory_space<vmem>>, vector<8x512xf32>
    tpu.vector_store %arg5[%c0_12, %c0_13], %23 {strides = array<i32>} : memref<8x512xf32, #tpu.memory_space<vmem>>, vector<8x512xf32>,
    return
  }
  func.func @transform_0(%arg0: i32) -> (i32, i32) {
    %c0_i32 = arith.constant 0 : i32
    %c0_i32_0 = arith.constant 0 : i32
    %c0_i32_1 = arith.constant 0 : i32
    return %c0_i32, %c0_i32_0 : i32, i32
  }
  func.func @transform_1(%arg0: i32) -> (i32, i32) {
    %c0_i32 = arith.constant 0 : i32
    %c0_i32_0 = arith.constant 0 : i32
    %c0_i32_1 = arith.constant 0 : i32
    return %c0_i32, %c0_i32_0 : i32, i32
  }
  func.func @transform_2(%arg0: i32) -> (i32, i32) {
    %c0_i32 = arith.constant 0 : i32
    %c0_i32_0 = arith.constant 0 : i32
    %c0_i32_1 = arith.constant 0 : i32
    return %c0_i32, %c0_i32_0 : i32, i32
  }
  func.func @transform_3(%arg0: i32) -> (i32, i32) {
    %c0_i32 = arith.constant 0 : i32
    %c0_i32_0 = arith.constant 0 : i32
    %c0_i32_1 = arith.constant 0 : i32
    return %c0_i32, %c0_i32_0 : i32, i32
  }
  func.func @transform_4(%arg0: i32) -> (i32, i32) {
    %c0_i32 = arith.constant 0 : i32
    %c0_i32_0 = arith.constant 0 : i32
    %c0_i32_1 = arith.constant 0 : i32
    return %c0_i32, %c0_i32_0 : i32, i32
  }
}

</mosaic_0001>

<bundles_post_ra>
// kernel: tpu_custom_call.1
= control target key start
LH: loop header
LB: loop body
LE: loop exit
PB: predicated region body
PF: predicated region fallthrough
CT: control target
= control target key end

     0   :  { %9 = vsyncpa [#allocation3], 0  ;;  %s380_s0 = inlined_call_operand.vmem [shape: f32[8,36], index: 0, kind: input, shape index: {}]   ;;  %s381_s1 = inlined_call_operand.hbm [shape: f32[36,512], index: 1, kind: input, shape index: {}]   ;;  %s382_s2 = inlined_call_operand.vmem [shape: f32[8,1], index: 2, kind: input, shape index: {}]   ;;  %s383_s3 = inlined_call_operand.vmem [shape: f32[8,1], index: 3, kind: input, shape index: {}]   ;;  %s384_s4 = inlined_call_operand.hbm [shape: f32[8,512], index: 4, kind: output, shape index: {}]  }
   0x1   :  { %10 = vsyncpa [#allocation4], 0  ;;  %s334_s15 = smov [#allocation2]  }
   0x2   :  { %s18_s16 = sshll.u32 %s334_s15, 4  ;;  %s19_s16 = int_to_ptr.vmem [resolvable:$true] %s18_s16 }
   0x3   :  { %s298_s17 = scalar_lea.vmem %s19_s16, 2560  ;;  %p303_p1 = scmp.lt.s32.totalorder %s19_s16, %s19_s16 }
   0x4   :  { %p299_p0 = scmp.ne.s32.totalorder %s19_s16, %s298_s17  ;;  %p304_p2 = scmp.lt.s32.totalorder %s298_s17, %s298_s17 }
   0x6   :  { %p305_p3 = por %p304_p2, %p303_p1 }
   0x8   :  { %p306_p4 = pnand %p305_p3, %p299_p0 }
   0xa   :  { %309 = shalt.err (!%p306_p4)
}
   0xb   :  { %s335_s18 = smov 512   ;;  %s336_s19 = smov 32  }
   0xc   :  { %24 = dma.hbm_to_vmem [thread:$0]  %s381_s1, 2560, %s19_s16, [#allocation3], %s335_s18, %s335_s18, %s336_s19  }
   0xd   :  { %330 = dma.done.wait [#allocation3], 2560  }
   0xe   :  { %331 = vsyncadd [#allocation3], 4294964736  ;;  %v337_v0 = vmov 0.0   ;;  %vm57_vm0 = vcmask 1043456   ;;  %v50_v1 = vld [vmem:[#allocation2 + $0x88] sm:$0xf] }
   0xf   :  { %134 = vmatprep.mubr.f32.mxu0 %v337_v0  ;;  %205 = vmatprep.mubr.f32.mxu1 %v337_v0  ;;  %v49_v2 = vld [vmem:[#allocation2 + $0x80] sm:$0xf]  ;;  %v46_v3 = vld [vmem:[#allocation2 + $0x68] sm:$0xff]  ;;  %v52_v4 = vld [vmem:[#allocation2 + $0x98] sm:$0xf]  ;;  %vm53_vm1 = vcmask 293888  }
  0x10   :  { %274 = vmatprep.subr.msk.mxu0 %vm57_vm0, %v50_v1  ;;  %v45_v5 = vld [vmem:[#allocation2 + $0x60] sm:$0xff]  ;;  %v51_v6 = vld [vmem:[#allocation2 + $0x90] sm:$0xf]  ;;  %277 = vmatprep.subr.msk.mxu1 %vm57_vm0, %v52_v4  ;;  %v42_v7 = vld [vmem:[#allocation2 + $0x48] sm:$0xff]  ;;  %v338_v42 = vmov 0   ;;  %s339_s26 = smov [#allocation5]  }
  0x11   :  { %275 = vmatpush1.msk.msra.mxu0 %vm57_vm0, %v49_v2  ;;  %v48_v8 = vld [vmem:[#allocation2 + $0x78] sm:$0xff]  ;;  %278 = vmatpush1.msk.msra.mxu1 %vm57_vm0, %v51_v6  ;;  %v41_v9 = vld [vmem:[#allocation2 + $0x40] sm:$0xff]  ;;  %v47_v10 = vld [vmem:[#allocation2 + $0x70] sm:$0xff]  ;;  %s265_s27 = sshll.u32 %s339_s26, 4  ;;  %s266_s27 = int_to_ptr.vmem [resolvable:$true] %s265_s27 }
  0x12   :  { %94 = vmatprep.subr.mxu0 %v46_v3  ;;  %v44_v11 = vld [vmem:[#allocation2 + $0x58] sm:$0xff]  ;;  %165 = vmatprep.subr.mxu1 %v48_v8  ;;  %v38_v12 = vld [vmem:[#allocation2 + $0x28] sm:$0xff]  ;;  %v43_v13 = vld [vmem:[#allocation2 + $0x50] sm:$0xff]  ;;  %p315_p6 = scmp.lt.s32.totalorder %s266_s27, %s266_s27 }
  0x13   :  { %95 = vmatpush1.msra.mxu0 %v45_v5  ;;  %166 = vmatpush1.msra.mxu1 %v47_v10  ;;  %v37_v14 = vld [vmem:[#allocation2 + $0x20] sm:$0xff]  ;;  %v40_v15 = vld [vmem:[#allocation2 + $0x38] sm:$0xff]  ;;  %v34_v16 = vld [vmem:[#allocation2 + $0x8] sm:$0xff] }
  0x14   :  { %96 = vmatprep.subr.mxu0 %v42_v7  ;;  %167 = vmatprep.subr.mxu1 %v44_v11  ;;  %v39_v17 = vld [vmem:[#allocation2 + $0x30] sm:$0xff]  ;;  %v33_v18 = vld [vmem:[#allocation2] sm:$0xff]  ;;  %v36_v19 = vld [vmem:[#allocation2 + $0x18] sm:$0xff] }
  0x15   :  { %97 = vmatpush1.msra.mxu0 %v41_v9  ;;  %168 = vmatpush1.msra.mxu1 %v43_v13  ;;  %v32_v20 = vld [vmem:[%s380_s0] sm:$0xff]  ;;  %v35_v21 = vld [vmem:[#allocation2 + $0x10] sm:$0xff] }
  0x16   :  { %98 = vmatprep.subr.mxu0 %v38_v12  ;;  %169 = vmatprep.subr.mxu1 %v40_v15  ;;  %v232_v46 = vld [vmem:[%s382_s2] sm:$0xff]  ;;  %s310_s2 = scalar_lea.vmem %s266_s27, 512 }
  0x17   :  { %99 = vmatpush1.msra.mxu0 %v37_v14  ;;  %170 = vmatpush1.msra.mxu1 %v39_v17  ;;  %v245_v49 = vld [vmem:[%s383_s3] sm:$0xff]  ;;  %p311_p5 = scmp.ne.s32.totalorder %s266_s27, %s310_s2  ;;  %p316_p7 = scmp.lt.s32.totalorder %s310_s2, %s310_s2 }
  0x18   :  { %100 = vmatprep.subr.mxu0 %v34_v16  ;;  %171 = vmatprep.subr.mxu1 %v36_v19 }
  0x19   :  { %101 = vmatpush1.msra.mxu0 %v33_v18  ;;  %172 = vmatpush1.msra.mxu1 %v35_v21  ;;  %p317_p8 = por %p316_p7, %p315_p6 }
  0x1a   :  { %276 = vmatmul.mubr.msk.f32.vlgmr.msra.gmra.mxu0 %vm53_vm1, %v32_v20  ;;  %279 = vmatmul.mubr.msk.f32.vlgmr.msra.gmra.mxu1 %vm53_vm1, %v32_v20 }
  0x1b   :  { %286 = vset.pattern.permute.xlu1 %v338_v42  ;;  %287 = vset.pattern.permute.xlu0 %v338_v42  ;;  %p318_p9 = pnand %p317_p8, %p311_p5 }
  0xda   :  { %v136_v22 = vpop.f32.mrf.mxu0  ;;  %v207_v24 = vpop.f32.mrf.mxu1 }
  0xdc   :  { %v138_v23 = vpop.f32.mrf.mxu0  ;;  %v209_v27 = vpop.f32.mrf.mxu1 }
  0xdd   :  { %v212_v25 = vadd.f32 %v138_v23, %v136_v22 }
  0xdf   :  { %v213_v26 = vadd.f32 %v212_v25, %v207_v24 }
  0xe1   :  { %v214_v28 = vadd.f32 %v213_v26, %v209_v27 }
  0xe3   :  { %215 = vadd.xlane.f32.xlu0 %v214_v28 }
 0x16c   :  { %v216_v29 = vpop.xlane.xlu0 %215 }
 0x16d   :  { %v217_v30 = vmul.f32 0.001953125, %v216_v29 }
 0x16f   :  { %v218_v31 = vsub.f32 %v136_v22, %v217_v30  ;;  %v219_v32 = vsub.f32 %v138_v23, %v217_v30  ;;  %v220_v33 = vsub.f32 %v207_v24, %v217_v30  ;;  %v221_v34 = vsub.f32 %v209_v27, %v217_v30 }
 0x171   :  { %v222_v35 = vmul.f32 %v218_v31, %v218_v31  ;;  %v223_v36 = vmul.f32 %v219_v32, %v219_v32  ;;  %v224_v37 = vmul.f32 %v220_v33, %v220_v33  ;;  %v225_v39 = vmul.f32 %v221_v34, %v221_v34 }
 0x173   :  { %v226_v38 = vadd.f32 %v223_v36, %v222_v35 }
 0x175   :  { %v227_v40 = vadd.f32 %v226_v38, %v224_v37 }
 0x177   :  { %v228_v41 = vadd.f32 %v227_v40, %v225_v39 }
 0x179   :  { %229 = vadd.xlane.f32.xlu0 %v228_v41 }
 0x202   :  { %v230_v43 = vpop.xlane.xlu0 %229 }
 0x203   :  { %v231_v44 = vmul.f32 0.001953125, %v230_v43 }
 0x205   :  { %v233_v45 = vadd.f32 1e-05, %v231_v44 }
 0x207   :  { %288 = vrsqrt.f32 %v233_v45 }
 0x214   :  { %v289_v47 = vpop.eup %288 }
 0x215   :  { %v235_v48 = vmul.f32 %v289_v47, %v232_v46 }
 0x217   :  { %238 = vperm.xlu1 %286, %v235_v48  }
 0x21b   :  { %248 = vperm.xlu1 %286, %v245_v49  }
 0x292   :  { %v239_v50 = vpop.permute.xlu1 %238 }
 0x293   :  { %v241_v51 = vmul.f32 %v239_v50, %v218_v31  ;;  %v242_v52 = vmul.f32 %v239_v50, %v219_v32  ;;  %v243_v53 = vmul.f32 %v239_v50, %v220_v33  ;;  %v244_v54 = vmul.f32 %v239_v50, %v221_v34 }
 0x296   :  { %v249_v55 = vpop.permute.xlu1 %248 }
 0x297   :  { %v251_v56 = vadd.f32 %v249_v55, %v241_v51  ;;  %v252_v57 = vadd.f32 %v249_v55, %v242_v52  ;;  %v253_v58 = vadd.f32 %v249_v55, %v243_v53  ;;  %v254_v59 = vadd.f32 %v249_v55, %v244_v54 }
 0x299   :  { %255 = vst [vmem:[#allocation5] sm:$0xff] %v251_v56  ;;  %256 = vst [vmem:[#allocation5 + $0x8] sm:$0xff] %v252_v57 }
 0x29a   :  { %257 = vst [vmem:[#allocation5 + $0x10] sm:$0xff] %v253_v58  ;;  %258 = vst [vmem:[#allocation5 + $0x18] sm:$0xff] %v254_v59 }
 0x29b   :  { %321 = shalt.err (!%p318_p9)
}
 0x29c   :  { %268 = dma.vmem_to_hbm [thread:$0]  %s266_s27, 512, %s384_s4, [#allocation4]  }
 0x29d   :  { %332 = dma.done.wait [#allocation4], 512  }
 0x29e   :  { %333 = vsyncadd [#allocation4], 4294966784 }
 0x29f   :  { %272 = vsyncpa [#allocation3], 1 }
 0x2a0   :  { %273 = vsyncpa [#allocation4], 1 }

</bundles_post_ra>
